<compile_context>
chip_gen: v7x
topology: tpu7x:2x2x1
jax: 0.10.0
libtpu: 0.0.40
codegen_flags: <defaults>
</compile_context>

<pallas_src>
import functools

import jax
import jax.numpy as jnp
import numpy as np
from jax.experimental import pallas as pl
from jax.experimental.pallas import tpu as pltpu


# ----------------------------------------------------------------------------
# In-kernel helpers
# ----------------------------------------------------------------------------
def _window_reduce(v, neg, pos, tap, fill, reduce_fn):
    """Reduce (max/min) over axis offsets o in [-neg, pos].

    `tap(u, o, fill)` must return u shifted by +o along the axis with
    out-of-range positions replaced by `fill` (geodesic / constant border).
    For wide windows uses log2 shift-doubling (van-Herk-like), otherwise a
    linear tap loop (3x3 / 5x5 stay linear).
    """
    n_off = neg + pos + 1
    if n_off <= 6 or neg < 0 or pos < 0:
        out = None
        for o in range(-neg, pos + 1):
            t = v if o == 0 else tap(v, o, fill)
            out = t if out is None else reduce_fn(out, t)
        return out

    def one_sided(win, sign):
        # extremum over offsets {0, sign*1, ..., sign*(win-1)} by doubling
        cur, length = v, 1
        while length * 2 <= win:
            cur = reduce_fn(cur, tap(cur, sign * length, fill))
            length *= 2
        if length < win:
            cur = reduce_fn(cur, tap(cur, sign * (win - length), fill))
        return cur

    fwd = one_sided(pos + 1, +1)
    if neg == 0:
        return fwd
    bwd = one_sided(neg + 1, -1)
    return reduce_fn(fwd, bwd)


def _bottom_hat_kernel(rc_ref, x_ref, o_ref, *, H, W, separable,
                       col_neg, col_pos, row_neg, row_pos,
                       dil_taps, ero_taps, dil_fill, ero_fill, use_roll):
    """One (tile_n, HWp) block of flattened images.

    Semantics (torch 'unfold' engine):
      dilation[i,j] = max_{di,dj} pad_d(x)[i+di, j+dj] + nb_flip[di,dj]
      erosion [i,j] = min_{di,dj} pad_e(d)[i+di, j+dj] - nb     [di,dj]
      bottom_hat    = erosion(dilation(x)) - x
    A 2-D tap at offset (a, b) on the flattened H*W axis is a circular lane
    shift by a*W + b plus a precomputed row/column validity mask.
    """
    x = x_ref[...].astype(jnp.float32)              # native dtype -> f32 in-reg
    shape = x.shape
    HWp = shape[-1]

    # --- memoized full-block index planes & per-shift validity masks --------
    # (materialized once: JAX does not CSE broadcast_in_dim across taps)
    idx_cache = {}

    def _index(which):
        if which not in idx_cache:
            plane = rc_ref[0:1, :] if which == "row" else rc_ref[1:2, :]
            idx_cache[which] = jnp.broadcast_to(plane, shape)
        return idx_cache[which]

    mask_cache = {}

    def _mask(axis, off):
        key = (axis, off)
        if key not in mask_cache:
            if axis == "col":
                idx, size = _index("col"), W
            else:
                idx, size = _index("row"), H
            mask_cache[key] = (idx < size - off) if off > 0 else (idx >= -off)
        return mask_cache[key]

    def _shift(u, k):
        """u[(p + k) mod HWp] along the flat lane axis (static k)."""
        k %= HWp
        if k == 0:
            return u
        if use_roll:
            return pltpu.roll(u, HWp - k, axis=1)    # XLU rotation
        return jnp.concatenate([u[:, k:], u[:, :k]], axis=1)   # fallback path

    def col_tap(u, s, fill):
        return jnp.where(_mask("col", s), _shift(u, s), fill)

    def row_tap(u, a, fill):
        return jnp.where(_mask("row", a), _shift(u, a * W), fill)

    def tap2d(u, a, s, fill):
        t = _shift(u, a * W + s)
        if a != 0 and s != 0:
            m = jnp.logical_and(_mask("row", a), _mask("col", s))
        elif a != 0:
            m = _mask("row", a)
        elif s != 0:
            m = _mask("col", s)
        else:
            return t
        return jnp.where(m, t, fill)

    if separable:
        # Flat SE with every tap active: rectangle -> separable row/col passes.
        r = _window_reduce(x, col_neg, col_pos, col_tap, dil_fill, jnp.maximum)
        dil = _window_reduce(r, row_neg, row_pos, row_tap, dil_fill, jnp.maximum)
        r = _window_reduce(dil, col_neg, col_pos, col_tap, ero_fill, jnp.minimum)
        ero = _window_reduce(r, row_neg, row_pos, row_tap, ero_fill, jnp.minimum)
    else:
        # General taps (kernel==0 taps were dropped in the wrapper; they can
        # only win in the degenerate border case where EVERY active tap falls
        # outside the image under geodesic padding).
        dil = None
        for a, s, c in dil_taps:
            t = tap2d(x, a, s, dil_fill)
            if c != 0.0:
                t = t + c
            dil = t if dil is None else jnp.maximum(dil, t)
        ero = None
        for a, s, c in ero_taps:
            t = tap2d(dil, a, s, ero_fill)
            if c != 0.0:
                t = t + c
            ero = t if ero is None else jnp.minimum(ero, t)

    o_ref[...] = (ero - x).astype(o_ref.dtype)


# ----------------------------------------------------------------------------
# Wrapper
# ----------------------------------------------------------------------------
def _vmem_capacity_bytes():
    try:
        cap = int(pltpu.get_tpu_info().vmem_capacity_bytes)
        if cap > 0:
            return cap
    except Exception:
        pass
    try:
        kind = jax.devices()[0].device_kind.lower()
        if any(t in kind for t in ("v4", "v5", "v6")):
            return 128 * 1024 * 1024
    except Exception:
        pass
    return 64 * 1024 * 1024        # conservative (v7x-sized) default


def _bottom_hat_impl(image, kernel, structuring_element, origin, border_type,
                     border_value, max_val, use_roll):
    B, C, H, W = image.shape
    kernel_np = np.asarray(kernel, dtype=np.float32)
    se_h, se_w = kernel_np.shape
    if origin is None:
        origin = [se_h // 2, se_w // 2]
    top, left = int(origin[0]), int(origin[1])

    if structuring_element is None:
        nb = np.zeros((se_h, se_w), dtype=np.float32)
    else:
        nb = np.array(structuring_element, dtype=np.float32, copy=True)
    nb[kernel_np == 0] = -float(max_val)
    nb_flip = nb[::-1, ::-1]
    kflip = kernel_np[::-1, ::-1]
    separable = bool(np.all(nb == 0.0))            # flat SE, every tap active

    if border_type == "geodesic":
        dil_fill, ero_fill = -float(max_val), float(max_val)
    elif border_type == "constant":
        dil_fill = ero_fill = float(border_value)
    else:
        # TODO(synk): 'reflect'/'replicate' border types are not implemented.
        raise NotImplementedError(f"border_type {border_type!r} not supported")

    # Taps for the general (non-separable) path; kernel==0 taps are skipped.
    dil_taps = tuple((di - top, dj - left, float(nb_flip[di, dj]))
                     for di in range(se_h) for dj in range(se_w)
                     if kflip[di, dj] != 0)
    ero_taps = tuple((di - top, dj - left, -float(nb[di, dj]))
                     for di in range(se_h) for dj in range(se_w)
                     if kernel_np[di, dj] != 0)
    if not dil_taps:                               # degenerate all-zero kernel
        dil_taps = tuple((di - top, dj - left, float(nb_flip[di, dj]))
                         for di in range(se_h) for dj in range(se_w))
        ero_taps = tuple((di - top, dj - left, -float(nb[di, dj]))
                         for di in range(se_h) for dj in range(se_w))

    N, HW = B * C, H * W
    HWp = ((HW + 127) // 128) * 128
    x = image.reshape(N, HW)
    if HWp != HW:
        # Lane-dense output (unmasked vst) needs a 128-multiple lane axis.
        # TODO(synk): this costs one extra HBM pass; a masked-store variant
        # would avoid it for H*W not a multiple of 128.
        x = jnp.pad(x, ((0, 0), (0, HWp - HW)))

    pos_idx = jnp.arange(HWp, dtype=jnp.int32)
    rowcol = jnp.stack([pos_idx // W, pos_idx % W])          # (2, HWp) int32

    # --- block sizing (per TPU generation VMEM) ------------------------------
    itemsize = int(np.dtype(image.dtype).itemsize)
    sub = max(8, 32 // itemsize)           # sublane tile: 8 f32 / 16 bf16 / 32 i8
    vmem_cap = _vmem_capacity_bytes()
    if vmem_cap >= 100 * 1024 * 1024:      # v4 / v5e / v6e (128 MiB VMEM)
        vmem_limit = 96 * 1024 * 1024
    else:                                   # v7x (64 MiB VMEM) or unknown
        vmem_limit = min(48 * 1024 * 1024, int(vmem_cap * 3 // 4))
    vmem_limit = max(vmem_limit, 16 * 1024 * 1024)

    # rough per-element VMEM bytes: double-buffered in/out (native dtype),
    # ~6 live f32 temporaries, i32 index planes and cached bool masks.
    n_masks = (se_h - 1) + (se_w - 1) + 2
    per_elem = 4 * itemsize + 40 + 4 * n_masks
    budget_rows = int(vmem_limit * 0.6) // (per_elem * HWp)
    if budget_rows < min(N, sub):
        # TODO(synk): spatial tiling with an (se_h-1)-row halo for very large
        # single images; currently each block carries the full H*W axis.
        raise NotImplementedError(
            f"{H}x{W} images are too large for whole-image blocks in VMEM")

    half_aligned = ((N + 1) // 2 + sub - 1) // sub * sub
    if budget_rows >= N:
        # Split into >=2 grid steps when possible so both v7x TensorCores
        # get work under dimension_semantics=("parallel",).
        tile_n = half_aligned if half_aligned < N else N
    else:
        tile_n = max(sub, budget_rows // sub * sub)
    grid_n = pl.cdiv(N, tile_n)            # partial tail block handled by Pallas

    kern = functools.partial(
        _bottom_hat_kernel, H=H, W=W, separable=separable,
        col_neg=left, col_pos=se_w - 1 - left,
        row_neg=top, row_pos=se_h - 1 - top,
        dil_taps=dil_taps, ero_taps=ero_taps,
        dil_fill=dil_fill, ero_fill=ero_fill, use_roll=use_roll)

    out = pl.pallas_call(
        kern,
        out_shape=jax.ShapeDtypeStruct((N, HWp), image.dtype),
        grid=(grid_n,),
        in_specs=[pl.BlockSpec((2, HWp), lambda i: (0, 0)),       # index planes
                  pl.BlockSpec((tile_n, HWp), lambda i: (i, 0))],
        out_specs=pl.BlockSpec((tile_n, HWp), lambda i: (i, 0)),
        compiler_params=pltpu.CompilerParams(
            dimension_semantics=("parallel",),
            vmem_limit_bytes=vmem_limit),
    )(rowcol, x)

    return out[:, :HW].reshape(B, C, H, W)


# One-time probe: prefer pltpu.roll (XLU), fall back to slice+concat shifts if
# roll is unavailable or its semantics don't match on this backend.
_USE_ROLL = None


def _use_roll():
    global _USE_ROLL
    if _USE_ROLL is None:
        img = ((jnp.arange(2 * 16 * 32, dtype=jnp.float32) * 0.37) % 1.9
               ).reshape(1, 2, 16, 32)
        ker = jnp.ones((3, 3), jnp.float32)
        ref = _bottom_hat_ref(img, ker)
        try:
            got = _bottom_hat_impl(img, ker, None, None, "geodesic", 0.0,
                                   10000.0, use_roll=True)
            _USE_ROLL = bool(jnp.allclose(got, ref, atol=1e-4))
        except Exception:
            _USE_ROLL = False
    return _USE_ROLL


def bottom_hat_pallas(image, kernel, structuring_element=None, origin=None,
                      border_type="geodesic", border_value=0.0,
                      max_val=10000.0, engine="unfold"):
    """image: (B, C, H, W); kernel: (se_h, se_w) flat structuring element."""
    del engine  # both torch engines compute the same result
    return _bottom_hat_impl(image, kernel, structuring_element, origin,
                            border_type, border_value, max_val,
                            use_roll=_use_roll())


class BottomHat:
    """Forward-only equivalent of the torch BottomHat module."""

    def __init__(self, kernel, structuring_element=None, origin=None,
                 border_type="geodesic", border_value=0.0, max_val=10000.0,
                 engine="unfold"):
        self.kernel = kernel
        self.structuring_element = structuring_element
        self.origin = origin
        self.border_type = border_type
        self.border_value = border_value
        self.max_val = max_val
        self.engine = engine

    def __call__(self, image):
        return bottom_hat_pallas(image, self.kernel, self.structuring_element,
                                 self.origin, self.border_type,
                                 self.border_value, self.max_val, self.engine)


# ----------------------------------------------------------------------------
# Pure-JAX reference (torch unfold-engine semantics)
# ----------------------------------------------------------------------------
def _bottom_hat_ref(image, kernel, structuring_element=None, max_val=10000.0):
    B, C, H, W = image.shape
    kernel = jnp.asarray(kernel, jnp.float32)
    se_h, se_w = kernel.shape
    oh, ow = se_h // 2, se_w // 2
    if structuring_element is None:
        nb = jnp.where(kernel == 0, -max_val, 0.0)
    else:
        nb = jnp.where(kernel == 0, -max_val,
                       jnp.asarray(structuring_element, jnp.float32))
    nbf = nb[::-1, ::-1]

    pad = jnp.pad(image.astype(jnp.float32),
                  ((0, 0), (0, 0), (oh, se_h - oh - 1), (ow, se_w - ow - 1)),
                  constant_values=-max_val)
    dil = jnp.full((B, C, H, W), -jnp.inf, jnp.float32)
    for di in range(se_h):
        for dj in range(se_w):
            dil = jnp.maximum(dil, pad[:, :, di:di + H, dj:dj + W] + nbf[di, dj])

    pad2 = jnp.pad(dil,
                   ((0, 0), (0, 0), (oh, se_h - oh - 1), (ow, se_w - ow - 1)),
                   constant_values=max_val)
    ero = jnp.full((B, C, H, W), jnp.inf, jnp.float32)
    for di in range(se_h):
        for dj in range(se_w):
            ero = jnp.minimum(ero, pad2[:, :, di:di + H, dj:dj + W] - nb[di, dj])

    return (ero - image.astype(jnp.float32)).astype(image.dtype)


# ----------------------------------------------------------------------------
# Self-test
# ----------------------------------------------------------------------------
if __name__ == "__main__":
    key = jax.random.PRNGKey(0)
    k1, k2, k3 = jax.random.split(key, 3)

    # 1) flat 3x3 SE -> separable fast path (via the module-style wrapper).
    img = jax.random.uniform(k1, (2, 4, 16, 16), dtype=jnp.float32)
    se3 = jnp.ones((3, 3), jnp.float32)
    out = jax.block_until_ready(BottomHat(se3)(img))
    np.testing.assert_allclose(np.asarray(out),
                               np.asarray(_bottom_hat_ref(img, se3)),
                               rtol=1e-5, atol=1e-5)

    # 2) cross-shaped SE (zeros in the corners) -> general tap path.
    cross = jnp.asarray([[0., 1., 0.], [1., 1., 1.], [0., 1., 0.]], jnp.float32)
    out = jax.block_until_ready(bottom_hat_pallas(img, cross))
    np.testing.assert_allclose(np.asarray(out),
                               np.asarray(_bottom_hat_ref(img, cross)),
                               rtol=1e-5, atol=1e-5)

    # 3) wide flat 7x7 SE -> separable path with log2 shift-doubling.
    se7 = jnp.ones((7, 7), jnp.float32)
    out = jax.block_until_ready(bottom_hat_pallas(img, se7))
    np.testing.assert_allclose(np.asarray(out),
                               np.asarray(_bottom_hat_ref(img, se7)),
                               rtol=1e-5, atol=1e-5)

    # 4) H*W not a multiple of 128 -> lane-padded path.
    img10 = jax.random.uniform(k2, (2, 4, 10, 10), dtype=jnp.float32)
    out = jax.block_until_ready(bottom_hat_pallas(img10, se3))
    np.testing.assert_allclose(np.asarray(out),
                               np.asarray(_bottom_hat_ref(img10, se3)),
                               rtol=1e-5, atol=1e-5)

    # 5) native bf16 I/O with a >=2-step grid (both v7x cores get work).
    imgbf = jax.random.uniform(k3, (4, 8, 16, 16),
                               dtype=jnp.float32).astype(jnp.bfloat16)
    out = jax.block_until_ready(bottom_hat_pallas(imgbf, se3))
    ref = _bottom_hat_ref(imgbf, se3)
    np.testing.assert_allclose(np.asarray(out.astype(jnp.float32)),
                               np.asarray(ref.astype(jnp.float32)),
                               rtol=0, atol=3e-2)

    print("KERNEL_OK")
</pallas_src>

<mosaic_0001>
module attributes {stable_mosaic.version = 11 : i64} {
  func.func @_bottom_hat_kernel(%arg0: i32, %arg1: memref<2x512xi32, #tpu.memory_space<vmem>>, %arg2: memref<2x512xf32, #tpu.memory_space<vmem>>, %arg3: memref<2x512xf32, #tpu.memory_space<vmem>>) attributes {dimension_semantics = [#tpu.dimension_semantics<parallel>], iteration_bounds = array<i64: 1>, scalar_prefetch = 0 : i64, scratch_operands = 0 : i64, tpu.core_type = #tpu.core_type<tc>, window_params = [{pipeline_mode = #tpu.pipeline_mode<synchronous>, transform_indices = @transform_0, window_bounds = array<i64: 2, 512>}, {transform_indices = @transform_1, window_bounds = array<i64: 2, 512>}, {transform_indices = @transform_2, window_bounds = array<i64: 2, 512>}]} {
    %c0 = arith.constant 0 : index
    %c0_0 = arith.constant 0 : index
    %0 = vector.load %arg2[%c0, %c0_0] : memref<2x512xf32, #tpu.memory_space<vmem>>, vector<2x512xf32>
    %c1 = arith.constant 1 : index
    %c0_1 = arith.constant 0 : index
    %1 = vector.load %arg1[%c1, %c0_1] : memref<2x512xi32, #tpu.memory_space<vmem>>, vector<1x512xi32>
    %2 = vector.shape_cast %1 : vector<1x512xi32> to vector<1x512xi32>
    %3 = vector.broadcast %2 : vector<1x512xi32> to vector<2x512xi32>
    %c1_i32 = arith.constant 1 : i32
    %4 = vector.broadcast %c1_i32 : i32 to vector<2x512xi32>
    %5 = arith.cmpi sge, %3, %4 : vector<2x512xi32>
    %c1_i32_2 = arith.constant 1 : i32
    %6 = tpu.dynamic_rotate %0 by %c1_i32_2 dim 1 : vector<2x512xf32>, i32 -> vector<2x512xf32>
    %cst = arith.constant -1.000000e+04 : f32
    %7 = vector.broadcast %cst : f32 to vector<2x512xf32>
    %8 = arith.select %5, %6, %7 : vector<2x512xi1>, vector<2x512xf32>
    %9 = arith.maximumf %8, %0 : vector<2x512xf32>
    %c31_i32 = arith.constant 31 : i32
    %10 = vector.broadcast %c31_i32 : i32 to vector<2x512xi32>
    %11 = arith.cmpi slt, %3, %10 : vector<2x512xi32>
    %c511_i32 = arith.constant 511 : i32
    %12 = tpu.dynamic_rotate %0 by %c511_i32 dim 1 : vector<2x512xf32>, i32 -> vector<2x512xf32>
    %cst_3 = arith.constant -1.000000e+04 : f32
    %13 = vector.broadcast %cst_3 : f32 to vector<2x512xf32>
    %14 = arith.select %11, %12, %13 : vector<2x512xi1>, vector<2x512xf32>
    %15 = arith.maximumf %9, %14 : vector<2x512xf32>
    %c0_4 = arith.constant 0 : index
    %c0_5 = arith.constant 0 : index
    %16 = vector.load %arg1[%c0_4, %c0_5] : memref<2x512xi32, #tpu.memory_space<vmem>>, vector<1x512xi32>
    %17 = vector.shape_cast %16 : vector<1x512xi32> to vector<1x512xi32>
    %18 = vector.broadcast %17 : vector<1x512xi32> to vector<2x512xi32>
    %c1_i32_6 = arith.constant 1 : i32
    %19 = vector.broadcast %c1_i32_6 : i32 to vector<2x512xi32>
    %20 = arith.cmpi sge, %18, %19 : vector<2x512xi32>
    %c32_i32 = arith.constant 32 : i32
    %21 = tpu.dynamic_rotate %15 by %c32_i32 dim 1 : vector<2x512xf32>, i32 -> vector<2x512xf32>
    %cst_7 = arith.constant -1.000000e+04 : f32
    %22 = vector.broadcast %cst_7 : f32 to vector<2x512xf32>
    %23 = arith.select %20, %21, %22 : vector<2x512xi1>, vector<2x512xf32>
    %24 = arith.maximumf %23, %15 : vector<2x512xf32>
    %c15_i32 = arith.constant 15 : i32
    %25 = vector.broadcast %c15_i32 : i32 to vector<2x512xi32>
    %26 = arith.cmpi slt, %18, %25 : vector<2x512xi32>
    %c480_i32 = arith.constant 480 : i32
    %27 = tpu.dynamic_rotate %15 by %c480_i32 dim 1 : vector<2x512xf32>, i32 -> vector<2x512xf32>
    %cst_8 = arith.constant -1.000000e+04 : f32
    %28 = vector.broadcast %cst_8 : f32 to vector<2x512xf32>
    %29 = arith.select %26, %27, %28 : vector<2x512xi1>, vector<2x512xf32>
    %30 = arith.maximumf %24, %29 : vector<2x512xf32>
    %c1_i32_9 = arith.constant 1 : i32
    %31 = tpu.dynamic_rotate %30 by %c1_i32_9 dim 1 : vector<2x512xf32>, i32 -> vector<2x512xf32>
    %cst_10 = arith.constant 1.000000e+04 : f32
    %32 = vector.broadcast %cst_10 : f32 to vector<2x512xf32>
    %33 = arith.select %5, %31, %32 : vector<2x512xi1>, vector<2x512xf32>
    %34 = arith.minimumf %33, %30 : vector<2x512xf32>
    %c511_i32_11 = arith.constant 511 : i32
    %35 = tpu.dynamic_rotate %30 by %c511_i32_11 dim 1 : vector<2x512xf32>, i32 -> vector<2x512xf32>
    %cst_12 = arith.constant 1.000000e+04 : f32
    %36 = vector.broadcast %cst_12 : f32 to vector<2x512xf32>
    %37 = arith.select %11, %35, %36 : vector<2x512xi1>, vector<2x512xf32>
    %38 = arith.minimumf %34, %37 : vector<2x512xf32>
    %c32_i32_13 = arith.constant 32 : i32
    %39 = tpu.dynamic_rotate %38 by %c32_i32_13 dim 1 : vector<2x512xf32>, i32 -> vector<2x512xf32>
    %cst_14 = arith.constant 1.000000e+04 : f32
    %40 = vector.broadcast %cst_14 : f32 to vector<2x512xf32>
    %41 = arith.select %20, %39, %40 : vector<2x512xi1>, vector<2x512xf32>
    %42 = arith.minimumf %41, %38 : vector<2x512xf32>
    %c480_i32_15 = arith.constant 480 : i32
    %43 = tpu.dynamic_rotate %38 by %c480_i32_15 dim 1 : vector<2x512xf32>, i32 -> vector<2x512xf32>
    %cst_16 = arith.constant 1.000000e+04 : f32
    %44 = vector.broadcast %cst_16 : f32 to vector<2x512xf32>
    %45 = arith.select %26, %43, %44 : vector<2x512xi1>, vector<2x512xf32>
    %46 = arith.minimumf %42, %45 : vector<2x512xf32>
    %47 = arith.subf %46, %0 : vector<2x512xf32>
    %c0_17 = arith.constant 0 : index
    %c0_18 = arith.constant 0 : index
    %48 = vector.load %arg3[%c0_17, %c0_18] : memref<2x512xf32, #tpu.memory_space<vmem>>, vector<2x512xf32>
    tpu.vector_store %arg3[%c0_17, %c0_18], %47 {strides = array<i32>} : memref<2x512xf32, #tpu.memory_space<vmem>>, vector<2x512xf32>,
    return
  }
  func.func @transform_0(%arg0: i32) -> (i32, i32) {
    %c0_i32 = arith.constant 0 : i32
    %c0_i32_0 = arith.constant 0 : i32
    %c0_i32_1 = arith.constant 0 : i32
    return %c0_i32, %c0_i32_0 : i32, i32
  }
  func.func @transform_1(%arg0: i32) -> (i32, i32) {
    %c0_i32 = arith.constant 0 : i32
    %c0_i32_0 = arith.constant 0 : i32
    return %arg0, %c0_i32 : i32, i32
  }
  func.func @transform_2(%arg0: i32) -> (i32, i32) {
    %c0_i32 = arith.constant 0 : i32
    %c0_i32_0 = arith.constant 0 : i32
    return %arg0, %c0_i32 : i32, i32
  }
}

module attributes {stable_mosaic.version = 11 : i64} {
  func.func @_bottom_hat_kernel(%arg0: i32, %arg1: memref<2x256xi32, #tpu.memory_space<vmem>>, %arg2: memref<8x256xf32, #tpu.memory_space<vmem>>, %arg3: memref<8x256xf32, #tpu.memory_space<vmem>>) attributes {dimension_semantics = [#tpu.dimension_semantics<parallel>], iteration_bounds = array<i64: 1>, scalar_prefetch = 0 : i64, scratch_operands = 0 : i64, tpu.core_type = #tpu.core_type<tc>, window_params = [{pipeline_mode = #tpu.pipeline_mode<synchronous>, transform_indices = @transform_0, window_bounds = array<i64: 2, 256>}, {transform_indices = @transform_1, window_bounds = array<i64: 8, 256>}, {transform_indices = @transform_2, window_bounds = array<i64: 8, 256>}]} {
    %c0 = arith.constant 0 : index
    %c0_0 = arith.constant 0 : index
    %0 = vector.load %arg2[%c0, %c0_0] : memref<8x256xf32, #tpu.memory_space<vmem>>, vector<8x256xf32>
    %c1 = arith.constant 1 : index
    %c0_1 = arith.constant 0 : index
    %1 = vector.load %arg1[%c1, %c0_1] : memref<2x256xi32, #tpu.memory_space<vmem>>, vector<1x256xi32>
    %2 = vector.shape_cast %1 : vector<1x256xi32> to vector<1x256xi32>
    %3 = vector.broadcast %2 : vector<1x256xi32> to vector<8x256xi32>
    %c1_i32 = arith.constant 1 : i32
    %4 = vector.broadcast %c1_i32 : i32 to vector<8x256xi32>
    %5 = arith.cmpi sge, %3, %4 : vector<8x256xi32>
    %6 = vector.extract_strided_slice %0 {offsets = [0, 255], sizes = [8, 1], strides = [1, 1]} : vector<8x256xf32> to vector<8x1xf32>
    %7 = vector.extract_strided_slice %0 {offsets = [0, 0], sizes = [8, 255], strides = [1, 1]} : vector<8x256xf32> to vector<8x255xf32>
    %8 = tpu.concatenate %6, %7 in 1 : vector<8x1xf32>, vector<8x255xf32> -> vector<8x256xf32>
    %cst = arith.constant -1.000000e+04 : f32
    %9 = vector.broadcast %cst : f32 to vector<8x256xf32>
    %10 = arith.select %5, %8, %9 : vector<8x256xi1>, vector<8x256xf32>
    %11 = arith.maximumf %10, %0 : vector<8x256xf32>
    %c15_i32 = arith.constant 15 : i32
    %12 = vector.broadcast %c15_i32 : i32 to vector<8x256xi32>
    %13 = arith.cmpi slt, %3, %12 : vector<8x256xi32>
    %14 = vector.extract_strided_slice %0 {offsets = [0, 1], sizes = [8, 255], strides = [1, 1]} : vector<8x256xf32> to vector<8x255xf32>
    %15 = vector.extract_strided_slice %0 {offsets = [0, 0], sizes = [8, 1], strides = [1, 1]} : vector<8x256xf32> to vector<8x1xf32>
    %16 = tpu.concatenate %14, %15 in 1 : vector<8x255xf32>, vector<8x1xf32> -> vector<8x256xf32>
    %cst_2 = arith.constant -1.000000e+04 : f32
    %17 = vector.broadcast %cst_2 : f32 to vector<8x256xf32>
    %18 = arith.select %13, %16, %17 : vector<8x256xi1>, vector<8x256xf32>
    %19 = arith.maximumf %11, %18 : vector<8x256xf32>
    %c0_3 = arith.constant 0 : index
    %c0_4 = arith.constant 0 : index
    %20 = vector.load %arg1[%c0_3, %c0_4] : memref<2x256xi32, #tpu.memory_space<vmem>>, vector<1x256xi32>
    %21 = vector.shape_cast %20 : vector<1x256xi32> to vector<1x256xi32>
    %22 = vector.broadcast %21 : vector<1x256xi32> to vector<8x256xi32>
    %c1_i32_5 = arith.constant 1 : i32
    %23 = vector.broadcast %c1_i32_5 : i32 to vector<8x256xi32>
    %24 = arith.cmpi sge, %22, %23 : vector<8x256xi32>
    %25 = vector.extract_strided_slice %19 {offsets = [0, 240], sizes = [8, 16], strides = [1, 1]} : vector<8x256xf32> to vector<8x16xf32>
    %26 = vector.extract_strided_slice %19 {offsets = [0, 0], sizes = [8, 240], strides = [1, 1]} : vector<8x256xf32> to vector<8x240xf32>
    %27 = tpu.concatenate %25, %26 in 1 : vector<8x16xf32>, vector<8x240xf32> -> vector<8x256xf32>
    %cst_6 = arith.constant -1.000000e+04 : f32
    %28 = vector.broadcast %cst_6 : f32 to vector<8x256xf32>
    %29 = arith.select %24, %27, %28 : vector<8x256xi1>, vector<8x256xf32>
    %30 = arith.maximumf %29, %19 : vector<8x256xf32>
    %c15_i32_7 = arith.constant 15 : i32
    %31 = vector.broadcast %c15_i32_7 : i32 to vector<8x256xi32>
    %32 = arith.cmpi slt, %22, %31 : vector<8x256xi32>
    %33 = vector.extract_strided_slice %19 {offsets = [0, 16], sizes = [8, 240], strides = [1, 1]} : vector<8x256xf32> to vector<8x240xf32>
    %34 = vector.extract_strided_slice %19 {offsets = [0, 0], sizes = [8, 16], strides = [1, 1]} : vector<8x256xf32> to vector<8x16xf32>
    %35 = tpu.concatenate %33, %34 in 1 : vector<8x240xf32>, vector<8x16xf32> -> vector<8x256xf32>
    %cst_8 = arith.constant -1.000000e+04 : f32
    %36 = vector.broadcast %cst_8 : f32 to vector<8x256xf32>
    %37 = arith.select %32, %35, %36 : vector<8x256xi1>, vector<8x256xf32>
    %38 = arith.maximumf %30, %37 : vector<8x256xf32>
    %39 = vector.extract_strided_slice %38 {offsets = [0, 255], sizes = [8, 1], strides = [1, 1]} : vector<8x256xf32> to vector<8x1xf32>
    %40 = vector.extract_strided_slice %38 {offsets = [0, 0], sizes = [8, 255], strides = [1, 1]} : vector<8x256xf32> to vector<8x255xf32>
    %41 = tpu.concatenate %39, %40 in 1 : vector<8x1xf32>, vector<8x255xf32> -> vector<8x256xf32>
    %cst_9 = arith.constant 1.000000e+04 : f32
    %42 = vector.broadcast %cst_9 : f32 to vector<8x256xf32>
    %43 = arith.select %5, %41, %42 : vector<8x256xi1>, vector<8x256xf32>
    %44 = arith.minimumf %43, %38 : vector<8x256xf32>
    %45 = vector.extract_strided_slice %38 {offsets = [0, 1], sizes = [8, 255], strides = [1, 1]} : vector<8x256xf32> to vector<8x255xf32>
    %46 = vector.extract_strided_slice %38 {offsets = [0, 0], sizes = [8, 1], strides = [1, 1]} : vector<8x256xf32> to vector<8x1xf32>
    %47 = tpu.concatenate %45, %46 in 1 : vector<8x255xf32>, vector<8x1xf32> -> vector<8x256xf32>
    %cst_10 = arith.constant 1.000000e+04 : f32
    %48 = vector.broadcast %cst_10 : f32 to vector<8x256xf32>
    %49 = arith.select %13, %47, %48 : vector<8x256xi1>, vector<8x256xf32>
    %50 = arith.minimumf %44, %49 : vector<8x256xf32>
    %51 = vector.extract_strided_slice %50 {offsets = [0, 240], sizes = [8, 16], strides = [1, 1]} : vector<8x256xf32> to vector<8x16xf32>
    %52 = vector.extract_strided_slice %50 {offsets = [0, 0], sizes = [8, 240], strides = [1, 1]} : vector<8x256xf32> to vector<8x240xf32>
    %53 = tpu.concatenate %51, %52 in 1 : vector<8x16xf32>, vector<8x240xf32> -> vector<8x256xf32>
    %cst_11 = arith.constant 1.000000e+04 : f32
    %54 = vector.broadcast %cst_11 : f32 to vector<8x256xf32>
    %55 = arith.select %24, %53, %54 : vector<8x256xi1>, vector<8x256xf32>
    %56 = arith.minimumf %55, %50 : vector<8x256xf32>
    %57 = vector.extract_strided_slice %50 {offsets = [0, 16], sizes = [8, 240], strides = [1, 1]} : vector<8x256xf32> to vector<8x240xf32>
    %58 = vector.extract_strided_slice %50 {offsets = [0, 0], sizes = [8, 16], strides = [1, 1]} : vector<8x256xf32> to vector<8x16xf32>
    %59 = tpu.concatenate %57, %58 in 1 : vector<8x240xf32>, vector<8x16xf32> -> vector<8x256xf32>
    %cst_12 = arith.constant 1.000000e+04 : f32
    %60 = vector.broadcast %cst_12 : f32 to vector<8x256xf32>
    %61 = arith.select %32, %59, %60 : vector<8x256xi1>, vector<8x256xf32>
    %62 = arith.minimumf %56, %61 : vector<8x256xf32>
    %63 = arith.subf %62, %0 : vector<8x256xf32>
    %c0_13 = arith.constant 0 : index
    %c0_14 = arith.constant 0 : index
    %64 = vector.load %arg3[%c0_13, %c0_14] : memref<8x256xf32, #tpu.memory_space<vmem>>, vector<8x256xf32>
    tpu.vector_store %arg3[%c0_13, %c0_14], %63 {strides = array<i32>} : memref<8x256xf32, #tpu.memory_space<vmem>>, vector<8x256xf32>,
    return
  }
  func.func @transform_0(%arg0: i32) -> (i32, i32) {
    %c0_i32 = arith.constant 0 : i32
    %c0_i32_0 = arith.constant 0 : i32
    %c0_i32_1 = arith.constant 0 : i32
    return %c0_i32, %c0_i32_0 : i32, i32
  }
  func.func @transform_1(%arg0: i32) -> (i32, i32) {
    %c0_i32 = arith.constant 0 : i32
    %c0_i32_0 = arith.constant 0 : i32
    return %arg0, %c0_i32 : i32, i32
  }
  func.func @transform_2(%arg0: i32) -> (i32, i32) {
    %c0_i32 = arith.constant 0 : i32
    %c0_i32_0 = arith.constant 0 : i32
    return %arg0, %c0_i32 : i32, i32
  }
}

</mosaic_0001>

<bundles_post_ra>
// kernel: tpu_custom_call.1
= control target key start
LH: loop header
LB: loop body
LE: loop exit
PB: predicated region body
PF: predicated region fallthrough
CT: control target
= control target key end

     0   :  { %7 = vsyncpa [#allocation3], 0  ;;  %s719_s0 = inlined_call_operand.hbm [shape: s32[2,512], index: 0, kind: input, shape index: {}]   ;;  %s720_s1 = inlined_call_operand.hbm [shape: f32[2,512], index: 1, kind: input, shape index: {}]   ;;  %s721_s2 = inlined_call_operand.hbm [shape: f32[2,512], index: 2, kind: output, shape index: {}]  }
   0x1   :  { %8 = vsyncpa [#allocation6], 0 }
   0x2   :  { %9 = vsyncpa [#allocation4], 0  ;;  %s400_s9 = smov [#allocation2]   ;;  %s401_s11 = smov [#allocation5]  }
   0x3   :  { %s16_s10 = sshll.u32 %s400_s9, 4  ;;  %s26_s12 = sshll.u32 %s401_s11, 4  ;;  %s17_s10 = int_to_ptr.vmem [resolvable:$true] %s16_s10  ;;  %s27_s12 = int_to_ptr.vmem [resolvable:$true] %s26_s12 }
   0x4   :  { %s328_s15 = scalar_lea.hbm %s719_s0, 128 }
   0x5   :  { %p329_p0 = scmp.ne.s32.totalorder %s719_s0, %s328_s15  ;;  %p332_p1 = scmp.lt.u32.totalorder %s328_s15, %s719_s0 }
   0x7   :  { %p334_p2 = pnand %p332_p1, %p329_p0 }
   0x9   :  { %337 = shalt.err (!%p334_p2)
}
   0xa   :  { %s338_s20 = scalar_lea.vmem %s17_s10, 128  ;;  %p343_p4 = scmp.lt.s32.totalorder %s17_s10, %s17_s10 }
   0xb   :  { %p339_p3 = scmp.ne.s32.totalorder %s17_s10, %s338_s20  ;;  %p344_p5 = scmp.lt.s32.totalorder %s338_s20, %s338_s20 }
   0xd   :  { %p345_p6 = por %p344_p5, %p343_p4 }
   0xf   :  { %p346_p7 = pnand %p345_p6, %p339_p3 }
  0x11   :  { %349 = shalt.err (!%p346_p7)
}
  0x12   :  { %19 = dma.hbm_to_vmem [thread:$0]  %s719_s0, 128, %s17_s10, [#allocation3]  }
  0x13   :  { %s350_s25 = scalar_lea.hbm %s720_s1, 128 }
  0x14   :  { %p351_p8 = scmp.ne.s32.totalorder %s720_s1, %s350_s25  ;;  %p354_p9 = scmp.lt.u32.totalorder %s350_s25, %s720_s1 }
  0x16   :  { %p356_p10 = pnand %p354_p9, %p351_p8 }
  0x18   :  { %359 = shalt.err (!%p356_p10)
}
  0x19   :  { %s360_s30 = scalar_lea.vmem %s27_s12, 128  ;;  %p365_p12 = scmp.lt.s32.totalorder %s27_s12, %s27_s12 }
  0x1a   :  { %p361_p11 = scmp.ne.s32.totalorder %s27_s12, %s360_s30  ;;  %p366_p13 = scmp.lt.s32.totalorder %s360_s30, %s360_s30 }
  0x1c   :  { %p367_p0 = por %p366_p13, %p365_p12 }
  0x1e   :  { %p368_p1 = pnand %p367_p0, %p361_p11 }
  0x20   :  { %371 = shalt.err (!%p368_p1)
}
  0x21   :  { %29 = dma.hbm_to_vmem [thread:$0]  %s720_s1, 128, %s27_s12, [#allocation6]  }
  0x22   :  { %394 = dma.done.wait [#allocation3], 128  }
  0x23   :  { %395 = vsyncadd [#allocation3], 4294967168 }
  0x24   :  { %396 = dma.done.wait [#allocation6], 128  }
  0x25   :  { %397 = vsyncadd [#allocation6], 4294967168  ;;  %v39_v0 = vlaneseq  ;;  %v402_v1 = vmov 1983009808   ;;  %v36_v6 = vld [vmem:[#allocation5] sm:$0xff]  ;;  %s403_s4 = smov 1  }
  0x26   :  { %v62_v2 = vunpack.c.l.s4 %v402_v1  ;;  %v60_v8 = vcombine.high %v36_v6, %v36_v6  ;;  %s404_s1 = smov 127   ;;  %v38_v16 = vld [vmem:[#allocation2 + $0x1] ss:$2 sm:$0xf]  ;;  %s405_s5 = smov 32  }
  0x27   :  { %v447_v3 = vshrl.u32 %v39_v0, 7  ;;  %v488_v19 = vand.u32 127, %v39_v0  ;;  %s406_s6 = smov 96   ;;  %v129_v55 = vld [vmem:[#allocation2] ss:$2 sm:$0xf] }
  0x28   :  { %v63_v4 = vunpack.c.0.s8 %v62_v2  ;;  %s407_s7 = smov [#allocation7]  }
  0x29   :  { %v45_v12 = vsub.s32 1, %v447_v3  ;;  %v49_v14 = vsub.s32 2, %v447_v3  ;;  %v41_v20 = vsub.s32 0, %v447_v3  ;;  %vm91_vm0 = vcmp.lt.s32.totalorder %v488_v19, 1  ;;  %s309_s8 = sshll.u32 %s407_s7, 4  ;;  %s310_s8 = int_to_ptr.vmem [resolvable:$true] %s309_s8 }
  0x2a   :  { %v450_v5 = vsub.s32 %v63_v4, %v447_v3  ;;  %v53_v23 = vsub.s32 3, %v447_v3  ;;  %vm116_vm5 = vcmp.lt.s32.totalorder %v488_v19, 127  ;;  %vm158_vm10 = vcmp.lt.s32.totalorder %v488_v19, 32  ;;  %s372_s9 = scalar_lea.vmem %s310_s8, 128  ;;  %p377_p3 = scmp.lt.s32.totalorder %s310_s8, %s310_s8 }
  0x2b   :  { %v486_v17 = vrot.slane %v38_v16, %v45_v12  ;;  %v493_v21 = vrot.slane %v38_v16, %v49_v14  ;;  %v500_v25 = vrot.slane %v38_v16, %v41_v20  ;;  %v564_v57 = vrot.slane %v129_v55, %v49_v14  ;;  %p373_p2 = scmp.ne.s32.totalorder %s310_s8, %s372_s9  ;;  %p378_p4 = scmp.lt.s32.totalorder %s372_s9, %s372_s9 }
  0x2c   :  { %v453_v7 = vrot.slane %v36_v6, %v450_v5  ;;  %v458_v9 = vrot.slane %v60_v8, %v450_v5  ;;  %v511_v29 = vrot.slane %v38_v16, %v53_v23  ;;  %v568_v59 = vrot.slane %v129_v55, %v45_v12 }
  0x2d   :  { %vm56_vm1 = vcmp.ge.s32.totalorder %v486_v17, 1  ;;  %vm57_vm2 = vcmp.ge.s32.totalorder %v493_v21, 1  ;;  %vm55_vm3 = vcmp.ge.s32.totalorder %v500_v25, 1  ;;  %vm105_vm4 = vcmp.lt.s32.totalorder %v486_v17, 31  ;;  %p379_p5 = por %p378_p4, %p377_p3 }
  0x2e   :  { %81 = vrot.lane.b32.xlu0 %v453_v7, %s403_s4  ;;  %85 = vrot.lane.b32.xlu1 %v458_v9, %s403_s4  ;;  %v464_v10 = vcombine.high %v453_v7, %v453_v7  ;;  %v472_v11 = vcombine.high %v458_v9, %v458_v9  ;;  %vm724_vm6 = vcmp.lt.s32.totalorder %v493_v21, 31  ;;  %vm58_vm7 = vcmp.ge.s32.totalorder %v511_v29, 1 }
  0x2f   :  { %vm104_vm8 = vcmp.lt.s32.totalorder %v500_v25, 31  ;;  %vm722_vm9 = vcmp.lt.s32.totalorder %v511_v29, 31  ;;  %vm723_vm11 = vcmp.ge.s32.totalorder %v564_v57, 1  ;;  %v574_v61 = vrot.slane %v129_v55, %v41_v20  ;;  %p380_p6 = pnand %p379_p5, %p373_p2 }
  0x30   :  { %vm725_vm12 = vcmp.ge.s32.totalorder %v568_v59, 1  ;;  %v583_v0 = vrot.slane %v129_v55, %v53_v23  ;;  %vm183_vm15 = vcmp.lt.s32.totalorder %v488_v19, 96 }
  0x31   :  { %vm146_vm13 = vcmp.ge.s32.totalorder %v574_v61, 1 }
  0x32   :  { %108 = vrot.lane.b32.xlu0 %v453_v7, %s404_s1  ;;  %110 = vrot.lane.b32.xlu1 %v464_v10, %s404_s1  ;;  %vm149_vm14 = vcmp.ge.s32.totalorder %v583_v0, 1 }
  0x36   :  { %83 = vrot.lane.b32.xlu0 %v464_v10, %s403_s4  ;;  %87 = vrot.lane.b32.xlu1 %v472_v11, %s403_s4 }
  0x3a   :  { %112 = vrot.lane.b32.xlu0 %v458_v9, %s404_s1  ;;  %114 = vrot.lane.b32.xlu1 %v472_v11, %s404_s1 }
  0xa0   :  { %v82_v13 = vpop.permute.xlu0 %81  ;;  %v86_v15 = vpop.permute.xlu1 %85 }
  0xa4   :  { %v109_v18 = vpop.permute.xlu0 %108  ;;  %v111_v22 = vpop.permute.xlu1 %110 }
  0xa5   :  { %v119_v44 = vsel %vm116_vm5, %v109_v18, %v111_v22 }
  0xa6   :  { %v121_v49 = vsel %vm104_vm8, %v119_v44, -10000.0 }
  0xa8   :  { %v84_v24 = vpop.permute.xlu0 %83  ;;  %v88_v30 = vpop.permute.xlu1 %87 }
  0xa9   :  { %v93_v26 = vsel %vm91_vm0, %v84_v24, %v86_v15  ;;  %v94_v27 = vsel %vm91_vm0, %v82_v13, %v84_v24  ;;  %v95_v31 = vsel %vm91_vm0, %v88_v30, %v82_v13  ;;  %v92_v40 = vsel %vm91_vm0, %v86_v15, %v88_v30 }
  0xaa   :  { %v97_v28 = vsel %vm56_vm1, %v94_v27, -10000.0  ;;  %v98_v32 = vsel %vm57_vm2, %v93_v26, -10000.0  ;;  %v96_v36 = vsel %vm55_vm3, %v95_v31, -10000.0  ;;  %v99_v48 = vsel %vm58_vm7, %v92_v40, -10000.0 }
  0xab   :  { %v101_v34 = vmax.f32 %v97_v28, %v464_v10  ;;  %v102_v39 = vmax.f32 %v98_v32, %v458_v9  ;;  %v100_v45 = vmax.f32 %v96_v36, %v453_v7  ;;  %v103_v51 = vmax.f32 %v99_v48, %v472_v11 }
  0xac   :  { %v113_v33 = vpop.permute.xlu0 %112  ;;  %v115_v38 = vpop.permute.xlu1 %114 }
  0xad   :  { %v118_v35 = vsel %vm116_vm5, %v111_v22, %v113_v33  ;;  %v117_v42 = vsel %vm116_vm5, %v113_v33, %v115_v38  ;;  %v120_v46 = vsel %vm116_vm5, %v115_v38, %v109_v18  ;;  %v125_v52 = vmax.f32 %v100_v45, %v121_v49 }
  0xae   :  { %v122_v37 = vsel %vm105_vm4, %v118_v35, -10000.0  ;;  %v123_v43 = vsel %vm724_vm6, %v117_v42, -10000.0  ;;  %v124_v50 = vsel %vm722_vm9, %v120_v46, -10000.0  ;;  %vm171_vm9 = vcmp.lt.s32.totalorder %v574_v61, 15 }
  0xaf   :  { %v532_v41 = vmax.f32 %v101_v34, %v122_v37  ;;  %v127_v47 = vmax.f32 %v102_v39, %v123_v43  ;;  %v128_v53 = vmax.f32 %v103_v51, %v124_v50  ;;  %vm173_vm6 = vcmp.lt.s32.totalorder %v564_v57, 15 }
  0xb1   :  { %152 = vrot.lane.b32.xlu1 %v532_v41, %s405_s5  ;;  %154 = vrot.lane.b32.xlu0 %v127_v47, %s405_s5 }
  0xb5   :  { %177 = vrot.lane.b32.xlu1 %v532_v41, %s406_s6  ;;  %150 = vrot.lane.b32.xlu0 %v125_v52, %s405_s5 }
  0xb9   :  { %156 = vrot.lane.b32.xlu1 %v128_v53, %s405_s5  ;;  %175 = vrot.lane.b32.xlu0 %v125_v52, %s406_s6 }
  0xbd   :  { %181 = vrot.lane.b32.xlu1 %v128_v53, %s406_s6  ;;  %179 = vrot.lane.b32.xlu0 %v127_v47, %s406_s6 }
 0x123   :  { %v153_v54 = vpop.permute.xlu1 %152  ;;  %v155_v56 = vpop.permute.xlu0 %154 }
 0x124   :  { %v160_v62 = vsel %vm158_vm10, %v153_v54, %v155_v56 }
 0x125   :  { %v165_v4 = vsel %vm723_vm11, %v160_v62, -10000.0  ;;  %vm172_vm11 = vcmp.lt.s32.totalorder %v568_v59, 15 }
 0x126   :  { %v169_v13 = vmax.f32 %v165_v4, %v127_v47 }
 0x127   :  { %v178_v58 = vpop.permute.xlu1 %177  ;;  %v151_v60 = vpop.permute.xlu0 %150 }
 0x128   :  { %v161_v63 = vsel %vm158_vm10, %v151_v60, %v153_v54 }
 0x129   :  { %v164_v6 = vsel %vm725_vm12, %v161_v63, -10000.0  ;;  %vm174_vm12 = vcmp.lt.s32.totalorder %v583_v0, 15 }
 0x12a   :  { %v168_v14 = vmax.f32 %v164_v6, %v532_v41 }
 0x12b   :  { %v157_v1 = vpop.permute.xlu1 %156  ;;  %v176_v2 = vpop.permute.xlu0 %175 }
 0x12c   :  { %v162_v8 = vsel %vm158_vm10, %v157_v1, %v151_v60  ;;  %v159_v12 = vsel %vm158_vm10, %v155_v56, %v157_v1  ;;  %v186_v18 = vsel %vm183_vm15, %v176_v2, %v178_v58 }
 0x12d   :  { %v163_v15 = vsel %vm146_vm13, %v162_v8, -10000.0  ;;  %v166_v24 = vsel %vm149_vm14, %v159_v12, -10000.0  ;;  %v188_v32 = vsel %vm171_vm9, %v186_v18, -10000.0 }
 0x12e   :  { %v167_v28 = vmax.f32 %v163_v15, %v125_v52  ;;  %v170_v34 = vmax.f32 %v166_v24, %v128_v53 }
 0x12f   :  { %v182_v3 = vpop.permute.xlu1 %181  ;;  %v180_v16 = vpop.permute.xlu0 %179 }
 0x130   :  { %v187_v20 = vsel %vm183_vm15, %v182_v3, %v176_v2  ;;  %v184_v22 = vsel %vm183_vm15, %v180_v16, %v182_v3  ;;  %v185_v23 = vsel %vm183_vm15, %v178_v58, %v180_v16  ;;  %v192_v35 = vmax.f32 %v167_v28, %v188_v32 }
 0x131   :  { %v189_v26 = vsel %vm172_vm11, %v185_v23, -10000.0  ;;  %v190_v27 = vsel %vm173_vm6, %v184_v22, -10000.0  ;;  %v191_v33 = vsel %vm174_vm12, %v187_v20, -10000.0 }
 0x132   :  { %v193_v30 = vmax.f32 %v168_v14, %v189_v26  ;;  %v194_v31 = vmax.f32 %v169_v13, %v190_v27  ;;  %v195_v36 = vmax.f32 %v170_v34, %v191_v33 }
 0x134   :  { %198 = vrot.lane.b32.xlu1 %v193_v30, %s403_s4  ;;  %200 = vrot.lane.b32.xlu0 %v194_v31, %s403_s4 }
 0x138   :  { %202 = vrot.lane.b32.xlu1 %v195_v36, %s403_s4  ;;  %196 = vrot.lane.b32.xlu0 %v192_v35, %s403_s4 }
 0x13c   :  { %218 = vrot.lane.b32.xlu1 %v193_v30, %s404_s1  ;;  %216 = vrot.lane.b32.xlu0 %v192_v35, %s404_s1 }
 0x140   :  { %222 = vrot.lane.b32.xlu1 %v195_v36, %s404_s1  ;;  %220 = vrot.lane.b32.xlu0 %v194_v31, %s404_s1 }
 0x1a6   :  { %v201_v37 = vpop.permute.xlu0 %200  ;;  %v199_v38 = vpop.permute.xlu1 %198 }
 0x1a7   :  { %v205_v42 = vsel %vm91_vm0, %v199_v38, %v201_v37 }
 0x1a8   :  { %v210_v47 = vsel %vm57_vm2, %v205_v42, 10000.0  ;;  %vm728_vm2 = vcmp.ge.s32.totalorder %v568_v59, 1 }
 0x1a9   :  { %v214_v54 = vmin.f32 %v210_v47, %v194_v31 }
 0x1aa   :  { %v197_v39 = vpop.permute.xlu0 %196  ;;  %v203_v40 = vpop.permute.xlu1 %202 }
 0x1ab   :  { %v207_v41 = vsel %vm91_vm0, %v203_v40, %v197_v39  ;;  %v206_v44 = vsel %vm91_vm0, %v197_v39, %v199_v38  ;;  %v204_v52 = vsel %vm91_vm0, %v201_v37, %v203_v40  ;;  %vm726_vm0 = vcmp.lt.s32.totalorder %v493_v21, 31 }
 0x1ac   :  { %v208_v43 = vsel %vm55_vm3, %v207_v41, 10000.0  ;;  %v209_v50 = vsel %vm56_vm1, %v206_v44, 10000.0  ;;  %v211_v25 = vsel %vm58_vm7, %v204_v52, 10000.0  ;;  %vm727_vm1 = vcmp.lt.s32.totalorder %v511_v29, 31 }
 0x1ad   :  { %v212_v48 = vmin.f32 %v208_v43, %v192_v35  ;;  %v213_v58 = vmin.f32 %v209_v50, %v193_v30  ;;  %v215_v3 = vmin.f32 %v211_v25, %v195_v36  ;;  %vm729_vm3 = vcmp.ge.s32.totalorder %v564_v57, 1 }
 0x1ae   :  { %v217_v45 = vpop.permute.xlu0 %216  ;;  %v219_v46 = vpop.permute.xlu1 %218 }
 0x1af   :  { %v226_v49 = vsel %vm116_vm5, %v217_v45, %v219_v46 }
 0x1b0   :  { %v228_v51 = vsel %vm104_vm8, %v226_v49, 10000.0 }
 0x1b1   :  { %v232_v53 = vmin.f32 %v212_v48, %v228_v51 }
 0x1b2   :  { %v221_v55 = vpop.permute.xlu0 %220  ;;  %v223_v56 = vpop.permute.xlu1 %222 }
 0x1b3   :  { %v225_v60 = vsel %vm116_vm5, %v219_v46, %v221_v55  ;;  %v224_v62 = vsel %vm116_vm5, %v221_v55, %v223_v56  ;;  %v227_v63 = vsel %vm116_vm5, %v223_v56, %v217_v45  ;;  %236 = vrot.lane.b32.xlu0 %v232_v53, %s405_s5 }
 0x1b4   :  { %v229_v1 = vsel %vm105_vm4, %v225_v60, 10000.0  ;;  %v230_v2 = vsel %vm726_vm0, %v224_v62, 10000.0  ;;  %v231_v8 = vsel %vm727_vm1, %v227_v63, 10000.0 }
 0x1b5   :  { %v233_v4 = vmin.f32 %v213_v58, %v229_v1  ;;  %v234_v6 = vmin.f32 %v214_v54, %v230_v2  ;;  %v235_v12 = vmin.f32 %v215_v3, %v231_v8 }
 0x1b7   :  { %238 = vrot.lane.b32.xlu1 %v233_v4, %s405_s5  ;;  %240 = vrot.lane.b32.xlu0 %v234_v6, %s405_s5 }
 0x1bb   :  { %242 = vrot.lane.b32.xlu1 %v235_v12, %s405_s5  ;;  %256 = vrot.lane.b32.xlu0 %v232_v53, %s406_s6 }
 0x1bf   :  { %258 = vrot.lane.b32.xlu1 %v233_v4, %s406_s6  ;;  %260 = vrot.lane.b32.xlu0 %v234_v6, %s406_s6 }
 0x1c3   :  { %262 = vrot.lane.b32.xlu1 %v235_v12, %s406_s6 }
 0x225   :  { %v237_v17 = vpop.permute.xlu0 %236 }
 0x229   :  { %v241_v21 = vpop.permute.xlu0 %240  ;;  %v239_v29 = vpop.permute.xlu1 %238 }
 0x22a   :  { %v246_v13 = vsel %vm158_vm10, %v237_v17, %v239_v29  ;;  %v245_v16 = vsel %vm158_vm10, %v239_v29, %v241_v21 }
 0x22b   :  { %v249_v18 = vsel %vm728_vm2, %v246_v13, 10000.0  ;;  %v250_v24 = vsel %vm729_vm3, %v245_v16, 10000.0 }
 0x22c   :  { %v253_v26 = vmin.f32 %v249_v18, %v233_v4  ;;  %v254_v38 = vmin.f32 %v250_v24, %v234_v6 }
 0x22d   :  { %v257_v14 = vpop.permute.xlu0 %256  ;;  %v243_v15 = vpop.permute.xlu1 %242 }
 0x22e   :  { %v247_v20 = vsel %vm158_vm10, %v243_v15, %v237_v17  ;;  %v244_v22 = vsel %vm158_vm10, %v241_v21, %v243_v15 }
 0x22f   :  { %v248_v23 = vsel %vm146_vm13, %v247_v20, 10000.0  ;;  %v251_v30 = vsel %vm149_vm14, %v244_v22, 10000.0 }
 0x230   :  { %v252_v31 = vmin.f32 %v248_v23, %v232_v53  ;;  %v255_v39 = vmin.f32 %v251_v30, %v235_v12 }
 0x231   :  { %v261_v27 = vpop.permute.xlu0 %260  ;;  %v259_v28 = vpop.permute.xlu1 %258 }
 0x232   :  { %v265_v32 = vsel %vm183_vm15, %v259_v28, %v261_v27  ;;  %v266_v33 = vsel %vm183_vm15, %v257_v14, %v259_v28 }
 0x233   :  { %v268_v34 = vsel %vm171_vm9, %v266_v33, 10000.0  ;;  %v269_v35 = vsel %vm172_vm11, %v265_v32, 10000.0 }
 0x234   :  { %v272_v36 = vmin.f32 %v252_v31, %v268_v34  ;;  %v273_v37 = vmin.f32 %v253_v26, %v269_v35 }
 0x235   :  { %v263_v40 = vpop.permute.xlu1 %262 }
 0x236   :  { %v276_v41 = vsub.f32 %v272_v36, %v453_v7  ;;  %v277_v42 = vsub.f32 %v273_v37, %v464_v10  ;;  %v264_v43 = vsel %vm183_vm15, %v261_v27, %v263_v40  ;;  %v267_v44 = vsel %vm183_vm15, %v263_v40, %v257_v14 }
 0x237   :  { %v270_v61 = vsel %vm173_vm6, %v264_v43, 10000.0  ;;  %v271_v59 = vsel %vm174_vm12, %v267_v44, 10000.0 }
 0x238   :  { %v274_v45 = vmin.f32 %v254_v38, %v270_v61  ;;  %v275_v46 = vmin.f32 %v255_v39, %v271_v59  ;;  %v284_v48 = vcombine.low %v276_v41, %v277_v42 }
 0x23a   :  { %v278_v47 = vsub.f32 %v274_v45, %v458_v9  ;;  %v279_v7 = vsub.f32 %v275_v46, %v472_v11  ;;  %v292_v49 = vrot.slane %v284_v48, %v450_v5 }
 0x23c   :  { %v285_v10 = vcombine.low %v278_v47, %v279_v7 }
 0x23e   :  { %v299_v19 = vrot.slane %v285_v10, %v450_v5 }
 0x240   :  { %v300_v50 = vcombine.low %v292_v49, %v299_v19 }
 0x242   :  { %302 = vst [vmem:[#allocation7] sm:$0xff] %v300_v50 }
 0x243   :  { %383 = shalt.err (!%p380_p6)
}
 0x244   :  { %s384_s12 = scalar_lea.hbm %s721_s2, 128 }
 0x245   :  { %p385_p7 = scmp.ne.s32.totalorder %s721_s2, %s384_s12  ;;  %p388_p8 = scmp.lt.u32.totalorder %s384_s12, %s721_s2 }
 0x247   :  { %p390_p9 = pnand %p388_p8, %p385_p7 }
 0x249   :  { %393 = shalt.err (!%p390_p9)
}
 0x24a   :  { %312 = dma.vmem_to_hbm [thread:$0]  %s310_s8, 128, %s721_s2, [#allocation4]  }
 0x24b   :  { %398 = dma.done.wait [#allocation4], 128  }
 0x24c   :  { %399 = vsyncadd [#allocation4], 4294967168 }
 0x24d   :  { %316 = vsyncpa [#allocation3], 1 }
 0x24e   :  { %317 = vsyncpa [#allocation6], 1 }
 0x24f   :  { %318 = vsyncpa [#allocation4], 1 }

// kernel: tpu_custom_call.1
= control target key start
LH: loop header
LB: loop body
LE: loop exit
PB: predicated region body
PF: predicated region fallthrough
CT: control target
= control target key end

     0   :  { %7 = vsyncpa [#allocation3], 0  ;;  %s414_s0 = inlined_call_operand.hbm [shape: s32[2,256], index: 0, kind: input, shape index: {}]   ;;  %s415_s1 = inlined_call_operand.hbm [shape: f32[8,256], index: 1, kind: input, shape index: {}]   ;;  %s416_s2 = inlined_call_operand.hbm [shape: f32[8,256], index: 2, kind: output, shape index: {}]  }
   0x1   :  { %8 = vsyncpa [#allocation6], 0 }
   0x2   :  { %9 = vsyncpa [#allocation4], 0  ;;  %s280_s9 = smov [#allocation2]   ;;  %s281_s11 = smov [#allocation5]  }
   0x3   :  { %s16_s10 = sshll.u32 %s280_s9, 4  ;;  %s26_s12 = sshll.u32 %s281_s11, 4  ;;  %s17_s10 = int_to_ptr.vmem [resolvable:$true] %s16_s10  ;;  %s27_s12 = int_to_ptr.vmem [resolvable:$true] %s26_s12 }
   0x4   :  { %s208_s15 = scalar_lea.hbm %s414_s0, 64 }
   0x5   :  { %p209_p0 = scmp.ne.s32.totalorder %s414_s0, %s208_s15  ;;  %p212_p1 = scmp.lt.u32.totalorder %s208_s15, %s414_s0 }
   0x7   :  { %p214_p2 = pnand %p212_p1, %p209_p0 }
   0x9   :  { %217 = shalt.err (!%p214_p2)
}
   0xa   :  { %s218_s20 = scalar_lea.vmem %s17_s10, 64  ;;  %p223_p4 = scmp.lt.s32.totalorder %s17_s10, %s17_s10 }
   0xb   :  { %p219_p3 = scmp.ne.s32.totalorder %s17_s10, %s218_s20  ;;  %p224_p5 = scmp.lt.s32.totalorder %s218_s20, %s218_s20 }
   0xd   :  { %p225_p6 = por %p224_p5, %p223_p4 }
   0xf   :  { %p226_p7 = pnand %p225_p6, %p219_p3 }
  0x11   :  { %229 = shalt.err (!%p226_p7)
}
  0x12   :  { %19 = dma.hbm_to_vmem [thread:$0]  %s414_s0, 64, %s17_s10, [#allocation3]  }
  0x13   :  { %s230_s25 = scalar_lea.hbm %s415_s1, 256 }
  0x14   :  { %p231_p8 = scmp.ne.s32.totalorder %s415_s1, %s230_s25  ;;  %p234_p9 = scmp.lt.u32.totalorder %s230_s25, %s415_s1 }
  0x16   :  { %p236_p10 = pnand %p234_p9, %p231_p8 }
  0x18   :  { %239 = shalt.err (!%p236_p10)
}
  0x19   :  { %s240_s30 = scalar_lea.vmem %s27_s12, 256  ;;  %p245_p12 = scmp.lt.s32.totalorder %s27_s12, %s27_s12 }
  0x1a   :  { %p241_p11 = scmp.ne.s32.totalorder %s27_s12, %s240_s30  ;;  %p246_p13 = scmp.lt.s32.totalorder %s240_s30, %s240_s30 }
  0x1c   :  { %p247_p0 = por %p246_p13, %p245_p12 }
  0x1e   :  { %p248_p1 = pnand %p247_p0, %p241_p11 }
  0x20   :  { %251 = shalt.err (!%p248_p1)
}
  0x21   :  { %29 = dma.hbm_to_vmem [thread:$0]  %s415_s1, 256, %s27_s12, [#allocation6]  }
  0x22   :  { %274 = dma.done.wait [#allocation3], 64  }
  0x23   :  { %275 = vsyncadd [#allocation3], 4294967232 }
  0x24   :  { %276 = dma.done.wait [#allocation6], 256  }
  0x25   :  { %277 = vsyncadd [#allocation6], 4294967040  ;;  %v326_v0 = vld [vmem:[#allocation5 + $0x8] sm:$0xff]  ;;  %v328_v1 = vld [vmem:[#allocation5] sm:$0xff]  ;;  %s282_s4 = smov 1   ;;  %s283_s5 = smov 127   ;;  %v40_v2 = vlaneseq }
  0x26   :  { %51 = vrot.lane.b32.xlu0 %v326_v0, %s282_s4  ;;  %68 = vrot.lane.b32.xlu1 %v328_v1, %s283_s5  ;;  %v39_v6 = vld [vmem:[#allocation2 + $0x1] ss:$2 sm:$0x3]  ;;  %vm72_vm0 = vcmask 1039360   ;;  %vm57_vm1 = vcmask 7168   ;;  %s284_s1 = smov 16  }
  0x27   :  { %v41_v3 = vshrl.u32 %v40_v2, 7  ;;  %s285_s6 = smov 112   ;;  %v82_v25 = vld [vmem:[#allocation2] ss:$2 sm:$0x3]  ;;  %vm100_vm6 = vcmask 130048  }
  0x28   :  { %vm115_vm9 = vcmask 916480   ;;  %s286_s7 = smov [#allocation7]  }
  0x29   :  { %v42_v4 = vsub.s32 0, %v41_v3  ;;  %v46_v5 = vsub.s32 1, %v41_v3  ;;  %s191_s8 = sshll.u32 %s286_s7, 4  ;;  %s192_s8 = int_to_ptr.vmem [resolvable:$true] %s191_s8 }
  0x2a   :  { %70 = vrot.lane.b32.xlu1 %v326_v0, %s283_s5  ;;  %55 = vrot.lane.b32.xlu0 %v328_v1, %s282_s4  ;;  %s252_s9 = scalar_lea.vmem %s192_s8, 256  ;;  %p257_p3 = scmp.lt.s32.totalorder %s192_s8, %s192_s8 }
  0x2b   :  { %v338_v7 = vrot.slane %v39_v6, %v42_v4  ;;  %v340_v8 = vrot.slane %v39_v6, %v46_v5  ;;  %v86_v26 = vrot.slane %v82_v25, %v42_v4  ;;  %v90_v27 = vrot.slane %v82_v25, %v46_v5  ;;  %p253_p2 = scmp.ne.s32.totalorder %s192_s8, %s252_s9  ;;  %p258_p4 = scmp.lt.s32.totalorder %s252_s9, %s252_s9 }
  0x2d   :  { %vm48_vm2 = vcmp.ge.s32.totalorder %v338_v7, 1  ;;  %vm49_vm3 = vcmp.ge.s32.totalorder %v340_v8, 1  ;;  %vm66_vm4 = vcmp.lt.s32.totalorder %v338_v7, 15  ;;  %vm67_vm5 = vcmp.lt.s32.totalorder %v340_v8, 15  ;;  %p259_p5 = por %p258_p4, %p257_p3 }
  0x2e   :  { %vm91_vm7 = vcmp.ge.s32.totalorder %v86_v26, 1  ;;  %vm92_vm8 = vcmp.ge.s32.totalorder %v90_v27, 1  ;;  %vm109_vm10 = vcmp.lt.s32.totalorder %v86_v26, 15  ;;  %vm110_vm11 = vcmp.lt.s32.totalorder %v90_v27, 15 }
  0x2f   :  { %p260_p6 = pnand %p259_p5, %p253_p2 }
  0x98   :  { %v52_v9 = vpop.permute.xlu0 %51  ;;  %v69_v10 = vpop.permute.xlu1 %68 }
  0x9c   :  { %v71_v11 = vpop.permute.xlu1 %70  ;;  %v56_v12 = vpop.permute.xlu0 %55 }
  0x9d   :  { %v73_v13 = vsel %vm72_vm0, %v69_v10, %v71_v11  ;;  %v77_v14 = vsel %vm72_vm0, %v71_v11, %v69_v10  ;;  %v58_v15 = vsel %vm57_vm1, %v56_v12, %v52_v9  ;;  %v61_v16 = vsel %vm57_vm1, %v52_v9, %v56_v12 }
  0x9e   :  { %v62_v17 = vsel %vm48_vm2, %v61_v16, -10000.0  ;;  %v63_v18 = vsel %vm49_vm3, %v58_v15, -10000.0  ;;  %v78_v21 = vsel %vm66_vm4, %v73_v13, -10000.0  ;;  %v79_v22 = vsel %vm67_vm5, %v77_v14, -10000.0 }
  0x9f   :  { %v64_v19 = vmax.f32 %v62_v17, %v328_v1  ;;  %v65_v20 = vmax.f32 %v63_v18, %v326_v0 }
  0xa1   :  { %v80_v23 = vmax.f32 %v64_v19, %v78_v21  ;;  %v81_v24 = vmax.f32 %v65_v20, %v79_v22 }
  0xa3   :  { %98 = vrot.lane.b32.xlu1 %v80_v23, %s284_s1  ;;  %94 = vrot.lane.b32.xlu0 %v81_v24, %s284_s1 }
  0xa7   :  { %113 = vrot.lane.b32.xlu1 %v81_v24, %s285_s6  ;;  %111 = vrot.lane.b32.xlu0 %v80_v23, %s285_s6 }
 0x115   :  { %v99_v28 = vpop.permute.xlu1 %98  ;;  %v95_v29 = vpop.permute.xlu0 %94 }
 0x116   :  { %v101_v30 = vsel %vm100_vm6, %v99_v28, %v95_v29  ;;  %v104_v31 = vsel %vm100_vm6, %v95_v29, %v99_v28 }
 0x117   :  { %v105_v32 = vsel %vm91_vm7, %v104_v31, -10000.0  ;;  %v106_v33 = vsel %vm92_vm8, %v101_v30, -10000.0 }
 0x118   :  { %v107_v36 = vmax.f32 %v105_v32, %v80_v23  ;;  %v108_v37 = vmax.f32 %v106_v33, %v81_v24 }
 0x119   :  { %v114_v34 = vpop.permute.xlu1 %113  ;;  %v112_v35 = vpop.permute.xlu0 %111 }
 0x11a   :  { %v116_v38 = vsel %vm115_vm9, %v112_v35, %v114_v34  ;;  %v120_v39 = vsel %vm115_vm9, %v114_v34, %v112_v35 }
 0x11b   :  { %v121_v40 = vsel %vm109_vm10, %v116_v38, -10000.0  ;;  %v122_v41 = vsel %vm110_vm11, %v120_v39, -10000.0 }
 0x11c   :  { %v123_v42 = vmax.f32 %v107_v36, %v121_v40  ;;  %v124_v43 = vmax.f32 %v108_v37, %v122_v41 }
 0x11e   :  { %126 = vrot.lane.b32.xlu0 %v124_v43, %s282_s4  ;;  %130 = vrot.lane.b32.xlu1 %v123_v42, %s282_s4 }
 0x122   :  { %140 = vrot.lane.b32.xlu0 %v123_v42, %s283_s5  ;;  %142 = vrot.lane.b32.xlu1 %v124_v43, %s283_s5 }
 0x190   :  { %v127_v44 = vpop.permute.xlu0 %126  ;;  %v131_v45 = vpop.permute.xlu1 %130 }
 0x191   :  { %v132_v46 = vsel %vm57_vm1, %v131_v45, %v127_v44  ;;  %v135_v47 = vsel %vm57_vm1, %v127_v44, %v131_v45 }
 0x192   :  { %v136_v48 = vsel %vm48_vm2, %v135_v47, 10000.0  ;;  %v137_v49 = vsel %vm49_vm3, %v132_v46, 10000.0 }
 0x193   :  { %v138_v52 = vmin.f32 %v136_v48, %v123_v42  ;;  %v139_v53 = vmin.f32 %v137_v49, %v124_v43 }
 0x194   :  { %v141_v50 = vpop.permute.xlu0 %140  ;;  %v143_v51 = vpop.permute.xlu1 %142 }
 0x195   :  { %v144_v54 = vsel %vm72_vm0, %v141_v50, %v143_v51  ;;  %v148_v55 = vsel %vm72_vm0, %v143_v51, %v141_v50 }
 0x196   :  { %v149_v56 = vsel %vm66_vm4, %v144_v54, 10000.0  ;;  %v150_v57 = vsel %vm67_vm5, %v148_v55, 10000.0 }
 0x197   :  { %v151_v58 = vmin.f32 %v138_v52, %v149_v56  ;;  %v152_v59 = vmin.f32 %v139_v53, %v150_v57 }
 0x199   :  { %154 = vrot.lane.b32.xlu0 %v152_v59, %s284_s1  ;;  %158 = vrot.lane.b32.xlu1 %v151_v58, %s284_s1 }
 0x19d   :  { %168 = vrot.lane.b32.xlu0 %v151_v58, %s285_s6  ;;  %170 = vrot.lane.b32.xlu1 %v152_v59, %s285_s6 }
 0x20b   :  { %v155_v60 = vpop.permute.xlu0 %154  ;;  %v159_v61 = vpop.permute.xlu1 %158 }
 0x20c   :  { %v160_v62 = vsel %vm100_vm6, %v159_v61, %v155_v60  ;;  %v163_v63 = vsel %vm100_vm6, %v155_v60, %v159_v61 }
 0x20d   :  { %v164_v2 = vsel %vm91_vm7, %v163_v63, 10000.0  ;;  %v165_v3 = vsel %vm92_vm8, %v160_v62, 10000.0 }
 0x20e   :  { %v166_v6 = vmin.f32 %v164_v2, %v151_v58  ;;  %v167_v7 = vmin.f32 %v165_v3, %v152_v59 }
 0x20f   :  { %v169_v4 = vpop.permute.xlu0 %168  ;;  %v171_v5 = vpop.permute.xlu1 %170 }
 0x210   :  { %v172_v8 = vsel %vm115_vm9, %v169_v4, %v171_v5  ;;  %v176_v9 = vsel %vm115_vm9, %v171_v5, %v169_v4 }
 0x211   :  { %v177_v10 = vsel %vm109_vm10, %v172_v8, 10000.0  ;;  %v178_v11 = vsel %vm110_vm11, %v176_v9, 10000.0 }
 0x212   :  { %v179_v12 = vmin.f32 %v166_v6, %v177_v10  ;;  %v180_v13 = vmin.f32 %v167_v7, %v178_v11 }
 0x214   :  { %v181_v14 = vsub.f32 %v179_v12, %v328_v1  ;;  %v182_v15 = vsub.f32 %v180_v13, %v326_v0 }
 0x216   :  { %183 = vst [vmem:[#allocation7] sm:$0xff] %v181_v14  ;;  %184 = vst [vmem:[#allocation7 + $0x8] sm:$0xff] %v182_v15 }
 0x217   :  { %263 = shalt.err (!%p260_p6)
}
 0x218   :  { %s264_s12 = scalar_lea.hbm %s416_s2, 256 }
 0x219   :  { %p265_p7 = scmp.ne.s32.totalorder %s416_s2, %s264_s12  ;;  %p268_p8 = scmp.lt.u32.totalorder %s264_s12, %s416_s2 }
 0x21b   :  { %p270_p9 = pnand %p268_p8, %p265_p7 }
 0x21d   :  { %273 = shalt.err (!%p270_p9)
}
 0x21e   :  { %194 = dma.vmem_to_hbm [thread:$0]  %s192_s8, 256, %s416_s2, [#allocation4]  }
 0x21f   :  { %278 = dma.done.wait [#allocation4], 256  }
 0x220   :  { %279 = vsyncadd [#allocation4], 4294967040 }
 0x221   :  { %198 = vsyncpa [#allocation3], 1 }
 0x222   :  { %199 = vsyncpa [#allocation6], 1 }
 0x223   :  { %200 = vsyncpa [#allocation4], 1 }

</bundles_post_ra>
